<compile_context>
chip_gen: v6e
topology: v6e:2x2x1
jax: 0.10.0
libtpu: 0.0.40
codegen_flags: <defaults>
</compile_context>

<pallas_src>
import functools

import jax
import jax.numpy as jnp
from jax.experimental import pallas as pl
from jax.experimental.pallas import tpu as pltpu


# ---------------------------------------------------------------------------
# pltpu.roll convention guard
# ---------------------------------------------------------------------------
# pltpu.roll is specified to match jnp.roll (out[i] = in[i - shift]); the conv
# taps below need out[i] = in[i + s], i.e. shift = -s under that convention.
# Verify once on-device, eagerly (before any jit trace), so a convention
# mismatch can never silently mirror the 3x3 taps.

_ROLL_SIGN = None  # -1 when pltpu.roll matches jnp.roll


def _resolve_roll_sign():
    global _ROLL_SIGN
    if _ROLL_SIGN is None:
        def k(x_ref, o_ref):
            o_ref[...] = pltpu.roll(x_ref[...], 3, 0)

        x = jnp.arange(8 * 128, dtype=jnp.float32).reshape(8, 128)
        y = pl.pallas_call(
            k, out_shape=jax.ShapeDtypeStruct((8, 128), jnp.float32))(x)
        _ROLL_SIGN = -1 if bool(jnp.array_equal(y, jnp.roll(x, 3, axis=0))) else 1
    return _ROLL_SIGN


def _roll_sign():
    return -1 if _ROLL_SIGN is None else _ROLL_SIGN


# ---------------------------------------------------------------------------
# In-kernel helpers (all operate on VMEM-resident values)
# ---------------------------------------------------------------------------

def _tap_geometry(H, W):
    """Per-tap sublane shifts + boundary masks for a 3x3 'same' conv on the
    flattened (H*W, C) activation.  Computed once per kernel invocation and
    reused by every conv in the network (masks depend only on H, W)."""
    HW = H * W
    r = jax.lax.broadcasted_iota(jnp.int32, (HW, 1), 0)
    h = r // W
    w = r - h * W
    shifts, masks = [], []
    for dy in (-1, 0, 1):
        hok = jnp.logical_and(h + dy >= 0, h + dy < H)
        for dx in (-1, 0, 1):
            if dy == 0 and dx == 0:
                shifts.append(0)
                masks.append(None)
                continue
            wok = jnp.logical_and(w + dx >= 0, w + dx < W)
            shifts.append(dy * W + dx)
            masks.append(jnp.logical_and(hok, wok))
    return shifts, masks


def _tap_bf16(x, shift, mask):
    """tap[r] = x[r + shift] (zero outside the frame), emitted in bf16.

    The shift is an XLU sublane rotate (32-bit source, then cast), the edge
    mask a VPU select -- no padded copies, no sublane-misaligned slices."""
    if shift != 0:
        x = pltpu.roll(x, (_roll_sign() * shift) % x.shape[0], 0)
    if mask is not None:
        x = jnp.where(mask, x, 0.0)
    return x.astype(jnp.bfloat16)


def _im2col(x, geom):
    """(H*W, C) f32 -> (H*W, 9*C) bf16 patch matrix, columns ordered
    (tap, cin) with tap = 3*(dy+1) + (dx+1)."""
    shifts, masks = geom
    return jnp.concatenate(
        [_tap_bf16(x, s, m) for s, m in zip(shifts, masks)], axis=-1)


def _conv3x3(x, w, b, geom, *, relu):
    """3x3 'same' conv as one MXU matmul with K = 9*Cin, f32 accumulation.

    x: (H*W, Cin) f32   w: (9*Cin, Cout) bf16   b: (1, Cout) f32
    (To port PyTorch weights (Cout, Cin, 3, 3): permute to (3, 3, Cin, Cout)
    and reshape to (9*Cin, Cout).)
    """
    acc = jnp.dot(_im2col(x, geom), w, preferred_element_type=jnp.float32) + b
    if relu:
        acc = jnp.maximum(acc, 0.0)
    return acc


def _se_gate(y, w1, w2):
    """Squeeze-Excitation gate: sigmoid(relu(mean_hw(y) @ w1) @ w2).
    y: (H*W, C) f32 -> (1, C) f32.  FC layers are bias-free, as in the spec."""
    pooled = jnp.sum(y, axis=0, keepdims=True) * (1.0 / y.shape[0])
    h = jnp.maximum(jnp.dot(pooled, w1, preferred_element_type=jnp.float32), 0.0)
    z = jnp.dot(h, w2, preferred_element_type=jnp.float32)
    return 1.0 / (1.0 + jnp.exp(-z))


# ---------------------------------------------------------------------------
# Fused whole-network kernel
# ---------------------------------------------------------------------------

def _encoder_kernel(num_blocks, n_layers, G0, G, x_ref, *refs):
    """VGG encoder + RDB chain + GFF + upscale conv for one batch element.

    refs = [vgg w1,b1,w2,b2,w3,b3,
            growth conv (w, b) per layer, each stacked over blocks,
            lff_w, lff_b, se_w1, se_w2,
            gff1_w, gff1_b, gff3_w, gff3_b, gff_se_w1, gff_se_w2,
            up_w, up_b,
            o_ref, patches_scratch]
    """
    patches = refs[-1]                      # (HW, 9*(G0+L*G)) bf16 scratch
    o_ref = refs[-2]
    wr = refs[:-2]
    vgg = wr[0:6]
    growth = wr[6:6 + 2 * n_layers]
    (lff_w, lff_b, se_w1, se_w2, g1_w, g1_b, g3_w, g3_b,
     gse_w1, gse_w2, up_w, up_b) = wr[6 + 2 * n_layers:]

    _, H, W, _ = x_ref.shape
    HW = H * W
    geom = _tap_geometry(H, W)              # hoisted: shared by every conv

    # --- VGG encoder: 3 x (conv3x3 + ReLU), all VMEM resident --------------
    x = x_ref[0].reshape(HW, -1)
    for c in range(3):
        x = _conv3x3(x, vgg[2 * c][...], vgg[2 * c + 1][...], geom, relu=True)
    # x: (HW, G0) f32

    def store_taps(col0, src):
        # Append the 9 taps of `src` to the persistent bf16 patch cache.
        seg = _im2col(src, geom)
        patches[:, col0:col0 + seg.shape[-1]] = seg

    # --- RDB chain; GFF 1x1 accumulated incrementally ----------------------
    g = jnp.zeros((HW, G0), jnp.float32)            # GFF 1x1 accumulator
    for b in range(num_blocks):
        # Seed the patch cache with the block input.  The LFF 1x1 over the
        # dense concat [x, out_0, ..., out_{L-1}] is accumulated term by term,
        # so the channel concat itself is never materialized.
        store_taps(0, x)
        y = jnp.dot(x.astype(jnp.bfloat16), lff_w[b, :G0, :],
                    preferred_element_type=jnp.float32)
        ncols = 9 * G0
        for c in range(n_layers):
            out = jnp.dot(patches[:, :ncols], growth[2 * c][b],
                          preferred_element_type=jnp.float32)
            out = jnp.maximum(out + growth[2 * c + 1][b], 0.0)
            store_taps(ncols, out)                  # only the new 9*G columns
            y = y + jnp.dot(out.astype(jnp.bfloat16),
                            lff_w[b, G0 + c * G:G0 + (c + 1) * G, :],
                            preferred_element_type=jnp.float32)
            ncols += 9 * G
        y = y + lff_b[b]
        x = y * _se_gate(y, se_w1[b], se_w2[b]) + x      # SE + local residual
        g = g + jnp.dot(x.astype(jnp.bfloat16), g1_w[b],
                        preferred_element_type=jnp.float32)

    # --- GFF: 1x1 (accumulated above) -> conv3x3 -> SE -> + last RDB out ---
    g = g + g1_b[...]
    t = _conv3x3(g, g3_w[...], g3_b[...], geom, relu=False)
    feat = t * _se_gate(t, gse_w1[...], gse_w2[...]) + x

    # --- upscale conv3x3 (lane-dense G0*r^2 output channels) ---------------
    up = _conv3x3(feat, up_w[...], up_b[...], geom, relu=False)
    o_ref[0] = up.reshape(H, W, -1).astype(o_ref.dtype)


# ---------------------------------------------------------------------------
# pallas_call wrapper + layout glue
# ---------------------------------------------------------------------------

def _rep_spec(arr):
    nd = arr.ndim
    return pl.BlockSpec(arr.shape, lambda n, _nd=nd: (0,) * _nd)


def _batch_spec(shape):
    nd = len(shape)
    return pl.BlockSpec((1,) + tuple(shape[1:]),
                        lambda n, _nd=nd: (n,) + (0,) * (_nd - 1))


def encoder_forward(x_nhwc, params, *, num_blocks, n_layers, G0, G):
    """One fused pallas_call: the only HBM traffic is the input frame, the
    weights and the final (H, W, G0*r^2) feature map."""
    N, H, W, _ = x_nhwc.shape
    c_up = params["up_w"].shape[-1]

    flat = []
    for wv, bv in params["vgg"]:
        flat += [wv, bv]
    for c in range(n_layers):
        flat += [params["rdb_conv_w"][c], params["rdb_conv_b"][c]]
    flat += [params["lff_w"], params["lff_b"], params["se_w1"], params["se_w2"],
             params["gff1_w"], params["gff1_b"], params["gff3_w"],
             params["gff3_b"], params["gff_se_w1"], params["gff_se_w2"],
             params["up_w"], params["up_b"]]

    kernel = functools.partial(_encoder_kernel, num_blocks, n_layers, G0, G)
    return pl.pallas_call(
        kernel,
        out_shape=jax.ShapeDtypeStruct((N, H, W, c_up), jnp.float32),
        grid=(N,),
        in_specs=[_batch_spec(x_nhwc.shape)] + [_rep_spec(a) for a in flat],
        out_specs=_batch_spec((N, H, W, c_up)),
        scratch_shapes=[
            pltpu.VMEM((H * W, 9 * (G0 + n_layers * G)), jnp.bfloat16)],
        compiler_params=pltpu.CompilerParams(
            dimension_semantics=("parallel",),
            vmem_limit_bytes=64 * 1024 * 1024),
    )(x_nhwc, *flat)


def pixel_shuffle_to_nchw(x, r):
    """PixelShuffle + NHWC->NCHW fused into a single relayout:
    out[n, c, h*r+i, w*r+j] = x[n, h, w, c*r*r + i*r + j]."""
    N, H, W, Cr2 = x.shape
    C = Cr2 // (r * r)
    x = x.reshape(N, H, W, C, r, r)
    x = jnp.transpose(x, (0, 3, 1, 4, 2, 5))
    return x.reshape(N, C, H * r, W * r)


def forward(x_nchw, params, cfg):
    x = jnp.transpose(x_nchw, (0, 2, 3, 1)).astype(jnp.float32)
    u = encoder_forward(
        x, params,
        num_blocks=cfg["num_rdb_blocks"], n_layers=cfg["n_conv_layers"],
        G0=cfg["grow_rate0"], G=cfg["grow_rate"])
    return pixel_shuffle_to_nchw(u, cfg["scale_factor"])


# ---------------------------------------------------------------------------
# Parameters
# ---------------------------------------------------------------------------

def init_params(key, *, in_channels, num_rdb_blocks, grow_rate0, grow_rate,
                n_conv_layers, scale_factor, reduction=16):
    keys = iter(jax.random.split(key, 256))
    G0, G, B, L = grow_rate0, grow_rate, num_rdb_blocks, n_conv_layers
    Cr = max(G0 // reduction, 1)

    def conv3(cin, cout):
        # Rows ordered (tap, cin), tap = 3*(dy+1)+(dx+1); to port PyTorch
        # weights (cout, cin, 3, 3): permute -> (3, 3, cin, cout), reshape.
        w = (jax.random.normal(next(keys), (9 * cin, cout), jnp.float32)
             * (1.0 / (9.0 * cin)) ** 0.5)
        b = jax.random.normal(next(keys), (1, cout), jnp.float32) * 0.01
        return w.astype(jnp.bfloat16), b

    def mat(shape, fan_in):
        return (jax.random.normal(next(keys), shape, jnp.float32)
                * (1.0 / fan_in) ** 0.5)

    p = {}
    p["vgg"] = [conv3(in_channels, G0), conv3(G0, G0), conv3(G0, G0)]

    # Growth convs: one (B, K_c, G) array per layer c, stacked over RDB blocks.
    # K_c rows are grouped per dense source [x, out_0, ..., out_{c-1}]; within
    # a source, rows are (tap, channel) to match the patch-cache layout.
    p["rdb_conv_w"], p["rdb_conv_b"] = [], []
    for c in range(L):
        kc = 9 * (G0 + c * G)
        p["rdb_conv_w"].append(mat((B, kc, G), kc).astype(jnp.bfloat16))
        p["rdb_conv_b"].append(
            jax.random.normal(next(keys), (B, 1, G), jnp.float32) * 0.01)

    clff = G0 + L * G
    p["lff_w"] = mat((B, clff, G0), clff).astype(jnp.bfloat16)
    p["lff_b"] = jax.random.normal(next(keys), (B, 1, G0), jnp.float32) * 0.01
    p["se_w1"] = mat((B, G0, Cr), G0)          # SE FCs: bias-free (per spec)
    p["se_w2"] = mat((B, Cr, G0), Cr)

    # GFF 1x1 weight pre-split per RDB output: slice b of the torch
    # (G0, B*G0, 1, 1) weight, transposed to (G0_in, G0_out).
    p["gff1_w"] = mat((B, G0, G0), B * G0).astype(jnp.bfloat16)
    p["gff1_b"] = jax.random.normal(next(keys), (1, G0), jnp.float32) * 0.01
    p["gff3_w"], p["gff3_b"] = conv3(G0, G0)
    p["gff_se_w1"] = mat((G0, Cr), G0)
    p["gff_se_w2"] = mat((Cr, G0), Cr)
    p["up_w"], p["up_b"] = conv3(G0, G0 * scale_factor ** 2)
    return p


# ---------------------------------------------------------------------------
# Main
# ---------------------------------------------------------------------------

if __name__ == "__main__":
    cfg = dict(
        in_channels=3,
        num_rdb_blocks=2,      # small, architecture-consistent instantiation
        grow_rate0=64,
        grow_rate=16,
        n_conv_layers=2,
        scale_factor=2,
        reduction=16,
    )
    N, H, W = 2, 16, 16

    _resolve_roll_sign()       # eager, before any jit trace

    key = jax.random.PRNGKey(0)
    pkey, xkey = jax.random.split(key)
    params = init_params(pkey, **cfg)
    x = jax.random.normal(xkey, (N, cfg["in_channels"], H, W), jnp.float32)

    fwd = jax.jit(lambda inp: forward(inp, params, cfg))
    out = fwd(x)
    jax.block_until_ready(out)

    expected = (N, cfg["grow_rate0"], H * cfg["scale_factor"],
                W * cfg["scale_factor"])
    assert out.shape == expected, (out.shape, expected)
    assert bool(jnp.all(jnp.isfinite(out)))
    print("KERNEL_OK")
</pallas_src>

<mosaic_0001>
module attributes {stable_mosaic.version = 11 : i64} {
  func.func @k(%arg0: memref<8x128xf32, #tpu.memory_space<vmem>>, %arg1: memref<8x128xf32, #tpu.memory_space<vmem>>) attributes {dimension_semantics = [], scalar_prefetch = 0 : i64, scratch_operands = 0 : i64, tpu.core_type = #tpu.core_type<tc>} {
    %c0 = arith.constant 0 : index
    %c0_0 = arith.constant 0 : index
    %0 = vector.load %arg0[%c0, %c0_0] : memref<8x128xf32, #tpu.memory_space<vmem>>, vector<8x128xf32>
    %c3_i32 = arith.constant 3 : i32
    %1 = tpu.dynamic_rotate %0 by %c3_i32 dim 0 : vector<8x128xf32>, i32 -> vector<8x128xf32>
    %c0_1 = arith.constant 0 : index
    %c0_2 = arith.constant 0 : index
    %2 = vector.load %arg1[%c0_1, %c0_2] : memref<8x128xf32, #tpu.memory_space<vmem>>, vector<8x128xf32>
    tpu.vector_store %arg1[%c0_1, %c0_2], %1 {strides = array<i32>} : memref<8x128xf32, #tpu.memory_space<vmem>>, vector<8x128xf32>,
    return
  }
}

</mosaic_0001>

<bundles_post_ra>
// kernel: tpu_custom_call.1
= control target key start
LH: loop header
LB: loop body
LE: loop exit
PB: predicated region body
PF: predicated region fallthrough
CT: control target
= control target key end

     0   :  { %6 = vsyncpa [#allocation3], 0  ;;  %s103_s0 = inlined_call_operand.hbm [shape: f32[8,128], index: 0, kind: input, shape index: {}]   ;;  %s104_s1 = inlined_call_operand.hbm [shape: f32[8,128], index: 1, kind: output, shape index: {}]  }
   0x1   :  { %7 = vsyncpa [#allocation4], 0  ;;  %s85_s6 = smov [#allocation2]  }
   0x2   :  { %s14_s7 = sshll.u32 %s85_s6, 4  ;;  %s15_s7 = int_to_ptr.vmem [resolvable:$true] %s14_s7 }
   0x3   :  { %s49_s8 = scalar_lea.vmem %s15_s7, 128  ;;  %p54_p1 = scmp.lt.s32.totalorder %s15_s7, %s15_s7 }
   0x4   :  { %p50_p0 = scmp.ne.s32.totalorder %s15_s7, %s49_s8  ;;  %p55_p2 = scmp.lt.s32.totalorder %s49_s8, %s49_s8 }
   0x6   :  { %p56_p3 = por %p55_p2, %p54_p1 }
   0x8   :  { %p57_p4 = pnand %p56_p3, %p50_p0 }
   0xa   :  { %60 = shalt.err (!%p57_p4)
}
   0xb   :  { %17 = dma.hbm_to_vmem [thread:$0]  %s103_s0, 128, %s15_s7, [#allocation3]  }
   0xc   :  { %81 = dma.done.wait [#allocation3], 128  }
   0xd   :  { %82 = vsyncadd [#allocation3], 4294967168  ;;  %s86_s11 = smov [#allocation5]   ;;  %v21_v0 = vld [vmem:[#allocation2] sm:$0xff] }
   0xe   :  { %s30_s12 = sshll.u32 %s86_s11, 4  ;;  %v22_v1 = vrot.slane %v21_v0, 5  ;;  %s31_s12 = int_to_ptr.vmem [resolvable:$true] %s30_s12 }
   0xf   :  { %s61_s13 = scalar_lea.vmem %s31_s12, 128  ;;  %p66_p6 = scmp.lt.s32.totalorder %s31_s12, %s31_s12 }
  0x10   :  { %23 = vst [vmem:[#allocation5] sm:$0xff] %v22_v1  ;;  %p62_p5 = scmp.ne.s32.totalorder %s31_s12, %s61_s13  ;;  %p67_p7 = scmp.lt.s32.totalorder %s61_s13, %s61_s13 }
  0x12   :  { %p68_p8 = por %p67_p7, %p66_p6 }
  0x14   :  { %p69_p9 = pnand %p68_p8, %p62_p5 }
  0x16   :  { %72 = shalt.err (!%p69_p9)
}
  0x17   :  { %33 = dma.vmem_to_hbm [thread:$0]  %s31_s12, 128, %s104_s1, [#allocation4]  }
  0x18   :  { %83 = dma.done.wait [#allocation4], 128  }
  0x19   :  { %84 = vsyncadd [#allocation4], 4294967168 }
  0x1a   :  { %37 = vsyncpa [#allocation3], 1 }
  0x1b   :  { %38 = vsyncpa [#allocation4], 1 }

</bundles_post_ra>
